<compile_context>
chip_gen: v5e
topology: v5e:2x2
jax: 0.10.0
libtpu: 0.0.40
codegen_flags: <defaults>
</compile_context>

<pallas_src>
import functools

import jax
import jax.numpy as jnp
from jax import lax
from jax.experimental import pallas as pl
from jax.experimental.pallas import tpu as pltpu

EPS = 1e-15
ROWS = 8          # 8 sublanes x 128 lanes = 1024 edges per grid step
LANES = 128


def _recon_loss_kernel(zt_ref, idx_ref, out_ref, *, e_pos, e_neg, rows):
    t = pl.program_id(0)
    zt = zt_ref[...]                                          # (D, N) f32, resident
    n_nodes = zt.shape[1]
    e_tot = e_pos + e_neg

    node_iota = lax.broadcasted_iota(jnp.int32, (n_nodes, 2 * LANES), 0)
    lane_iota = lax.broadcasted_iota(jnp.int32, (1, LANES), 1)
    sub_iota = lax.broadcasted_iota(jnp.int32, (rows, LANES), 0)

    acc_pos = jnp.zeros((1, LANES), jnp.float32)
    acc_neg = jnp.zeros((1, LANES), jnp.float32)
    base = t * (rows * LANES)

    for r in range(rows):                                     # static unroll
        # Fused index row: lanes [0,128) = src node ids, [128,256) = dst ids.
        idx_r = idx_ref[pl.ds(r, 1), :]                       # (1, 256) int32

        # One fused one-hot gather: (N,256) one-hot, single (D,N)@(N,256) matmul
        # -> lane-dense (D,256) MXU output holding [z[src] | z[dst]].
        oh = (node_iota == idx_r).astype(jnp.float32)         # (N, 256)
        g = jnp.dot(zt, oh, preferred_element_type=jnp.float32)   # (D, 256)
        zs = g[:, :LANES]                                     # lane-aligned slice
        zd = g[:, LANES:]
        score = jnp.sum(zs * zd, axis=0, keepdims=True)       # (1,128) per-edge logit

        # Static pos/neg split + padding mask from the global edge id.
        gid = base + r * LANES + lane_iota                    # (1,128)
        is_pos = gid < e_pos
        is_neg = jnp.logical_and(gid >= e_pos, gid < e_tot)

        # pos: -log(sigmoid(s)+EPS); neg: -log(1-sigmoid(s)+EPS) = -log(sigmoid(-s)+EPS)
        x = jnp.where(is_pos, score, -score)
        e = jnp.exp(-jnp.abs(x))                              # in (0, 1], never inf
        p = jnp.where(x >= 0.0, 1.0 / (1.0 + e), e / (1.0 + e))   # stable sigmoid
        loss = -jnp.log(p + EPS)                              # (1,128), always finite

        acc_pos = acc_pos + jnp.where(is_pos, loss, 0.0)
        acc_neg = acc_neg + jnp.where(is_neg, loss, 0.0)

    # Single lane-dense (8,128) store per step: row 0 = pos sums, row 1 = neg sums.
    out_ref[...] = (jnp.where(sub_iota == 0, acc_pos, 0.0)
                    + jnp.where(sub_iota == 1, acc_neg, 0.0))


def recon_loss(z, pos_edge_index, neg_edge_index):
    """z: (N, D) float; *_edge_index: (2, E) int. Returns scalar f32 loss."""
    z = jnp.asarray(z, jnp.float32)
    n_nodes, hidden = z.shape
    e_pos = int(pos_edge_index.shape[1])
    e_neg = int(neg_edge_index.shape[1])
    e_tot = e_pos + e_neg

    tile_edges = ROWS * LANES
    num_tiles = max(1, (e_tot + tile_edges - 1) // tile_edges)
    e_pad = num_tiles * tile_edges

    # Fused, lane-dense edge stream: [pos edges | neg edges | padding].
    src = jnp.concatenate(
        [pos_edge_index[0], neg_edge_index[0]]).astype(jnp.int32)
    dst = jnp.concatenate(
        [pos_edge_index[1], neg_edge_index[1]]).astype(jnp.int32)
    src = jnp.pad(src, (0, e_pad - e_tot)).reshape(num_tiles * ROWS, LANES)
    dst = jnp.pad(dst, (0, e_pad - e_tot)).reshape(num_tiles * ROWS, LANES)
    # One index tile per row: columns [0,128) = src, [128,256) = dst.
    idx = jnp.concatenate([src, dst], axis=1)                 # (num_tiles*ROWS, 256)

    z_t = z.T                                                 # (D, N) for lane-dense MXU output

    kernel = functools.partial(
        _recon_loss_kernel, e_pos=e_pos, e_neg=e_neg, rows=ROWS)

    out = pl.pallas_call(
        kernel,
        out_shape=jax.ShapeDtypeStruct((num_tiles * ROWS, LANES), jnp.float32),
        grid_spec=pltpu.PrefetchScalarGridSpec(
            num_scalar_prefetch=0,
            grid=(num_tiles,),
            in_specs=[
                pl.BlockSpec((hidden, n_nodes), lambda t: (0, 0)),     # z^T resident
                pl.BlockSpec((ROWS, 2 * LANES), lambda t: (t, 0)),     # fused idx tile
            ],
            out_specs=pl.BlockSpec((ROWS, LANES), lambda t: (t, 0)),
        ),
        compiler_params=pltpu.CompilerParams(
            dimension_semantics=("parallel",)),
    )(z_t, idx)

    out = out.reshape(num_tiles, ROWS, LANES)
    pos_loss = jnp.sum(out[:, 0, :]) / e_pos
    neg_loss = jnp.sum(out[:, 1, :]) / e_neg
    return pos_loss + neg_loss


def recon_loss_ref(z, pos_edge_index, neg_edge_index):
    """Pure-JAX reference mirroring the PyTorch forward (Euclidean decoder)."""
    def decode(edge_index):
        v = jnp.sum(z[edge_index[0]] * z[edge_index[1]], axis=1)
        return jax.nn.sigmoid(v)
    pos_loss = -jnp.mean(jnp.log(decode(pos_edge_index) + EPS))
    neg_loss = -jnp.mean(jnp.log(1.0 - decode(neg_edge_index) + EPS))
    return pos_loss + neg_loss


if __name__ == "__main__":
    key = jax.random.PRNGKey(0)
    k_z, k_pos, k_neg = jax.random.split(key, 3)

    n_nodes, hidden = 16, 32
    e_pos = 8
    sampling_times = 1                     # args.sampling_times
    e_neg = e_pos * sampling_times

    # Modest embedding scale keeps sigmoid away from f32 saturation, so the
    # EPS-based reference and the kernel agree tightly (semantics identical).
    z = 0.3 * jax.random.normal(k_z, (n_nodes, hidden), dtype=jnp.float32)
    pos_edge_index = jax.random.randint(
        k_pos, (2, e_pos), 0, n_nodes, dtype=jnp.int32)
    neg_edge_index = jax.random.randint(
        k_neg, (2, e_neg), 0, n_nodes, dtype=jnp.int32)

    loss = recon_loss(z, pos_edge_index, neg_edge_index)
    jax.block_until_ready(loss)

    ref = recon_loss_ref(z, pos_edge_index, neg_edge_index)
    assert jnp.isfinite(loss), loss
    assert jnp.allclose(loss, ref, rtol=1e-5, atol=1e-5), (loss, ref)

    print("KERNEL_OK")
</pallas_src>

<mosaic_0001>
module attributes {stable_mosaic.version = 11 : i64} {
  func.func @_recon_loss_kernel(%arg0: i32, %arg1: memref<32x16xf32, #tpu.memory_space<vmem>>, %arg2: memref<8x256xi32, #tpu.memory_space<vmem>>, %arg3: memref<8x128xf32, #tpu.memory_space<vmem>>) attributes {dimension_semantics = [#tpu.dimension_semantics<parallel>], iteration_bounds = array<i64: 1>, scalar_prefetch = 0 : i64, scratch_operands = 0 : i64, tpu.core_type = #tpu.core_type<tc>, window_params = [{pipeline_mode = #tpu.pipeline_mode<synchronous>, transform_indices = @transform_0, window_bounds = array<i64: 32, 16>}, {transform_indices = @transform_1, window_bounds = array<i64: 8, 256>}, {transform_indices = @transform_2, window_bounds = array<i64: 8, 128>}]} {
    %c0 = arith.constant 0 : index
    %c0_0 = arith.constant 0 : index
    %0 = vector.load %arg1[%c0, %c0_0] : memref<32x16xf32, #tpu.memory_space<vmem>>, vector<32x16xf32>
    %1 = tpu.iota {dimensions = array<i32: 0>} : vector<16x256xi32>
    %2 = tpu.iota {dimensions = array<i32: 1>} : vector<1x128xi32>
    %3 = tpu.iota {dimensions = array<i32: 0>} : vector<8x128xi32>
    %cst = arith.constant 0.000000e+00 : f32
    %4 = vector.broadcast %cst : f32 to vector<1x128xf32>
    %cst_1 = arith.constant 0.000000e+00 : f32
    %5 = vector.broadcast %cst_1 : f32 to vector<1x128xf32>
    %c1024_i32 = arith.constant 1024 : i32
    %6 = arith.muli %arg0, %c1024_i32 : i32
    %c0_2 = arith.constant 0 : index
    %c0_3 = arith.constant 0 : index
    %7 = vector.load %arg2[%c0_2, %c0_3] : memref<8x256xi32, #tpu.memory_space<vmem>>, vector<1x256xi32>
    %8 = vector.broadcast %7 : vector<1x256xi32> to vector<16x256xi32>
    %9 = arith.cmpi eq, %1, %8 : vector<16x256xi32>
    %10 = arith.extui %9 : vector<16x256xi1> to vector<16x256xi32>
    %11 = arith.sitofp %10 : vector<16x256xi32> to vector<16x256xf32>
    %cst_4 = arith.constant dense<0.000000e+00> : vector<32x256xf32>
    %12 = tpu.matmul %0, %11, %cst_4 {dimension_numbers = #tpu.dot_dimension_numbers<[1], [0], [0], [1], [0, 0, 1, 1], [], []>} : vector<32x16xf32>, vector<16x256xf32>, vector<32x256xf32> -> vector<32x256xf32>
    %13 = vector.extract_strided_slice %12 {offsets = [0, 0], sizes = [32, 128], strides = [1, 1]} : vector<32x256xf32> to vector<32x128xf32>
    %14 = vector.extract_strided_slice %12 {offsets = [0, 128], sizes = [32, 128], strides = [1, 1]} : vector<32x256xf32> to vector<32x128xf32>
    %15 = arith.mulf %13, %14 : vector<32x128xf32>
    %cst_5 = arith.constant dense<0.000000e+00> : vector<128xf32>
    %16 = vector.multi_reduction <add>, %15, %cst_5 [0] : vector<32x128xf32> to vector<128xf32>
    %17 = vector.shape_cast %16 : vector<128xf32> to vector<1x128xf32>
    %c0_i32 = arith.constant 0 : i32
    %18 = arith.addi %6, %c0_i32 : i32
    %19 = vector.broadcast %18 : i32 to vector<1x128xi32>
    %20 = arith.addi %19, %2 : vector<1x128xi32>
    %c8_i32 = arith.constant 8 : i32
    %21 = vector.broadcast %c8_i32 : i32 to vector<1x128xi32>
    %22 = arith.cmpi slt, %20, %21 : vector<1x128xi32>
    %c8_i32_6 = arith.constant 8 : i32
    %23 = vector.broadcast %c8_i32_6 : i32 to vector<1x128xi32>
    %24 = arith.cmpi sge, %20, %23 : vector<1x128xi32>
    %c16_i32 = arith.constant 16 : i32
    %25 = vector.broadcast %c16_i32 : i32 to vector<1x128xi32>
    %26 = arith.cmpi slt, %20, %25 : vector<1x128xi32>
    %27 = arith.andi %24, %26 : vector<1x128xi1>
    %cst_7 = arith.constant 0.000000e+00 : f32
    %28 = vector.broadcast %cst_7 : f32 to vector<1x128xf32>
    %29 = arith.subf %28, %17 : vector<1x128xf32>
    %30 = arith.select %22, %17, %29 : vector<1x128xi1>, vector<1x128xf32>
    %31 = math.absf %30 : vector<1x128xf32>
    %cst_8 = arith.constant 0.000000e+00 : f32
    %32 = vector.broadcast %cst_8 : f32 to vector<1x128xf32>
    %33 = arith.subf %32, %31 : vector<1x128xf32>
    %34 = math.exp %33 : vector<1x128xf32>
    %cst_9 = arith.constant 0.000000e+00 : f32
    %35 = vector.broadcast %cst_9 : f32 to vector<1x128xf32>
    %36 = arith.cmpf oge, %30, %35 : vector<1x128xf32>
    %cst_10 = arith.constant 1.000000e+00 : f32
    %37 = vector.broadcast %cst_10 : f32 to vector<1x128xf32>
    %38 = arith.addf %37, %34 : vector<1x128xf32>
    %cst_11 = arith.constant 1.000000e+00 : f32
    %39 = vector.broadcast %cst_11 : f32 to vector<1x128xf32>
    %40 = arith.divf %39, %38 : vector<1x128xf32>
    %cst_12 = arith.constant 1.000000e+00 : f32
    %41 = vector.broadcast %cst_12 : f32 to vector<1x128xf32>
    %42 = arith.addf %41, %34 : vector<1x128xf32>
    %43 = arith.divf %34, %42 : vector<1x128xf32>
    %44 = arith.select %36, %40, %43 : vector<1x128xi1>, vector<1x128xf32>
    %cst_13 = arith.constant 1.000000e-15 : f32
    %45 = vector.broadcast %cst_13 : f32 to vector<1x128xf32>
    %46 = arith.addf %44, %45 : vector<1x128xf32>
    %47 = math.log %46 : vector<1x128xf32>
    %cst_14 = arith.constant 0.000000e+00 : f32
    %48 = vector.broadcast %cst_14 : f32 to vector<1x128xf32>
    %49 = arith.subf %48, %47 : vector<1x128xf32>
    %cst_15 = arith.constant 0.000000e+00 : f32
    %50 = vector.broadcast %cst_15 : f32 to vector<1x128xf32>
    %51 = arith.select %22, %49, %50 : vector<1x128xi1>, vector<1x128xf32>
    %52 = arith.addf %4, %51 : vector<1x128xf32>
    %cst_16 = arith.constant 0.000000e+00 : f32
    %53 = vector.broadcast %cst_16 : f32 to vector<1x128xf32>
    %54 = arith.select %27, %49, %53 : vector<1x128xi1>, vector<1x128xf32>
    %55 = arith.addf %5, %54 : vector<1x128xf32>
    %c1 = arith.constant 1 : index
    %c0_17 = arith.constant 0 : index
    %56 = vector.load %arg2[%c1, %c0_17] : memref<8x256xi32, #tpu.memory_space<vmem>>, vector<1x256xi32>
    %57 = vector.broadcast %56 : vector<1x256xi32> to vector<16x256xi32>
    %58 = arith.cmpi eq, %1, %57 : vector<16x256xi32>
    %59 = arith.extui %58 : vector<16x256xi1> to vector<16x256xi32>
    %60 = arith.sitofp %59 : vector<16x256xi32> to vector<16x256xf32>
    %cst_18 = arith.constant dense<0.000000e+00> : vector<32x256xf32>
    %61 = tpu.matmul %0, %60, %cst_18 {dimension_numbers = #tpu.dot_dimension_numbers<[1], [0], [0], [1], [0, 0, 1, 1], [], []>} : vector<32x16xf32>, vector<16x256xf32>, vector<32x256xf32> -> vector<32x256xf32>
    %62 = vector.extract_strided_slice %61 {offsets = [0, 0], sizes = [32, 128], strides = [1, 1]} : vector<32x256xf32> to vector<32x128xf32>
    %63 = vector.extract_strided_slice %61 {offsets = [0, 128], sizes = [32, 128], strides = [1, 1]} : vector<32x256xf32> to vector<32x128xf32>
    %64 = arith.mulf %62, %63 : vector<32x128xf32>
    %cst_19 = arith.constant dense<0.000000e+00> : vector<128xf32>
    %65 = vector.multi_reduction <add>, %64, %cst_19 [0] : vector<32x128xf32> to vector<128xf32>
    %66 = vector.shape_cast %65 : vector<128xf32> to vector<1x128xf32>
    %c128_i32 = arith.constant 128 : i32
    %67 = arith.addi %6, %c128_i32 : i32
    %68 = vector.broadcast %67 : i32 to vector<1x128xi32>
    %69 = arith.addi %68, %2 : vector<1x128xi32>
    %c8_i32_20 = arith.constant 8 : i32
    %70 = vector.broadcast %c8_i32_20 : i32 to vector<1x128xi32>
    %71 = arith.cmpi slt, %69, %70 : vector<1x128xi32>
    %c8_i32_21 = arith.constant 8 : i32
    %72 = vector.broadcast %c8_i32_21 : i32 to vector<1x128xi32>
    %73 = arith.cmpi sge, %69, %72 : vector<1x128xi32>
    %c16_i32_22 = arith.constant 16 : i32
    %74 = vector.broadcast %c16_i32_22 : i32 to vector<1x128xi32>
    %75 = arith.cmpi slt, %69, %74 : vector<1x128xi32>
    %76 = arith.andi %73, %75 : vector<1x128xi1>
    %cst_23 = arith.constant 0.000000e+00 : f32
    %77 = vector.broadcast %cst_23 : f32 to vector<1x128xf32>
    %78 = arith.subf %77, %66 : vector<1x128xf32>
    %79 = arith.select %71, %66, %78 : vector<1x128xi1>, vector<1x128xf32>
    %80 = math.absf %79 : vector<1x128xf32>
    %cst_24 = arith.constant 0.000000e+00 : f32
    %81 = vector.broadcast %cst_24 : f32 to vector<1x128xf32>
    %82 = arith.subf %81, %80 : vector<1x128xf32>
    %83 = math.exp %82 : vector<1x128xf32>
    %cst_25 = arith.constant 0.000000e+00 : f32
    %84 = vector.broadcast %cst_25 : f32 to vector<1x128xf32>
    %85 = arith.cmpf oge, %79, %84 : vector<1x128xf32>
    %cst_26 = arith.constant 1.000000e+00 : f32
    %86 = vector.broadcast %cst_26 : f32 to vector<1x128xf32>
    %87 = arith.addf %86, %83 : vector<1x128xf32>
    %cst_27 = arith.constant 1.000000e+00 : f32
    %88 = vector.broadcast %cst_27 : f32 to vector<1x128xf32>
    %89 = arith.divf %88, %87 : vector<1x128xf32>
    %cst_28 = arith.constant 1.000000e+00 : f32
    %90 = vector.broadcast %cst_28 : f32 to vector<1x128xf32>
    %91 = arith.addf %90, %83 : vector<1x128xf32>
    %92 = arith.divf %83, %91 : vector<1x128xf32>
    %93 = arith.select %85, %89, %92 : vector<1x128xi1>, vector<1x128xf32>
    %cst_29 = arith.constant 1.000000e-15 : f32
    %94 = vector.broadcast %cst_29 : f32 to vector<1x128xf32>
    %95 = arith.addf %93, %94 : vector<1x128xf32>
    %96 = math.log %95 : vector<1x128xf32>
    %cst_30 = arith.constant 0.000000e+00 : f32
    %97 = vector.broadcast %cst_30 : f32 to vector<1x128xf32>
    %98 = arith.subf %97, %96 : vector<1x128xf32>
    %cst_31 = arith.constant 0.000000e+00 : f32
    %99 = vector.broadcast %cst_31 : f32 to vector<1x128xf32>
    %100 = arith.select %71, %98, %99 : vector<1x128xi1>, vector<1x128xf32>
    %101 = arith.addf %52, %100 : vector<1x128xf32>
    %cst_32 = arith.constant 0.000000e+00 : f32
    %102 = vector.broadcast %cst_32 : f32 to vector<1x128xf32>
    %103 = arith.select %76, %98, %102 : vector<1x128xi1>, vector<1x128xf32>
    %104 = arith.addf %55, %103 : vector<1x128xf32>
    %c2 = arith.constant 2 : index
    %c0_33 = arith.constant 0 : index
    %105 = vector.load %arg2[%c2, %c0_33] : memref<8x256xi32, #tpu.memory_space<vmem>>, vector<1x256xi32>
    %106 = vector.broadcast %105 : vector<1x256xi32> to vector<16x256xi32>
    %107 = arith.cmpi eq, %1, %106 : vector<16x256xi32>
    %108 = arith.extui %107 : vector<16x256xi1> to vector<16x256xi32>
    %109 = arith.sitofp %108 : vector<16x256xi32> to vector<16x256xf32>
    %cst_34 = arith.constant dense<0.000000e+00> : vector<32x256xf32>
    %110 = tpu.matmul %0, %109, %cst_34 {dimension_numbers = #tpu.dot_dimension_numbers<[1], [0], [0], [1], [0, 0, 1, 1], [], []>} : vector<32x16xf32>, vector<16x256xf32>, vector<32x256xf32> -> vector<32x256xf32>
    %111 = vector.extract_strided_slice %110 {offsets = [0, 0], sizes = [32, 128], strides = [1, 1]} : vector<32x256xf32> to vector<32x128xf32>
    %112 = vector.extract_strided_slice %110 {offsets = [0, 128], sizes = [32, 128], strides = [1, 1]} : vector<32x256xf32> to vector<32x128xf32>
    %113 = arith.mulf %111, %112 : vector<32x128xf32>
    %cst_35 = arith.constant dense<0.000000e+00> : vector<128xf32>
    %114 = vector.multi_reduction <add>, %113, %cst_35 [0] : vector<32x128xf32> to vector<128xf32>
    %115 = vector.shape_cast %114 : vector<128xf32> to vector<1x128xf32>
    %c256_i32 = arith.constant 256 : i32
    %116 = arith.addi %6, %c256_i32 : i32
    %117 = vector.broadcast %116 : i32 to vector<1x128xi32>
    %118 = arith.addi %117, %2 : vector<1x128xi32>
    %c8_i32_36 = arith.constant 8 : i32
    %119 = vector.broadcast %c8_i32_36 : i32 to vector<1x128xi32>
    %120 = arith.cmpi slt, %118, %119 : vector<1x128xi32>
    %c8_i32_37 = arith.constant 8 : i32
    %121 = vector.broadcast %c8_i32_37 : i32 to vector<1x128xi32>
    %122 = arith.cmpi sge, %118, %121 : vector<1x128xi32>
    %c16_i32_38 = arith.constant 16 : i32
    %123 = vector.broadcast %c16_i32_38 : i32 to vector<1x128xi32>
    %124 = arith.cmpi slt, %118, %123 : vector<1x128xi32>
    %125 = arith.andi %122, %124 : vector<1x128xi1>
    %cst_39 = arith.constant 0.000000e+00 : f32
    %126 = vector.broadcast %cst_39 : f32 to vector<1x128xf32>
    %127 = arith.subf %126, %115 : vector<1x128xf32>
    %128 = arith.select %120, %115, %127 : vector<1x128xi1>, vector<1x128xf32>
    %129 = math.absf %128 : vector<1x128xf32>
    %cst_40 = arith.constant 0.000000e+00 : f32
    %130 = vector.broadcast %cst_40 : f32 to vector<1x128xf32>
    %131 = arith.subf %130, %129 : vector<1x128xf32>
    %132 = math.exp %131 : vector<1x128xf32>
    %cst_41 = arith.constant 0.000000e+00 : f32
    %133 = vector.broadcast %cst_41 : f32 to vector<1x128xf32>
    %134 = arith.cmpf oge, %128, %133 : vector<1x128xf32>
    %cst_42 = arith.constant 1.000000e+00 : f32
    %135 = vector.broadcast %cst_42 : f32 to vector<1x128xf32>
    %136 = arith.addf %135, %132 : vector<1x128xf32>
    %cst_43 = arith.constant 1.000000e+00 : f32
    %137 = vector.broadcast %cst_43 : f32 to vector<1x128xf32>
    %138 = arith.divf %137, %136 : vector<1x128xf32>
    %cst_44 = arith.constant 1.000000e+00 : f32
    %139 = vector.broadcast %cst_44 : f32 to vector<1x128xf32>
    %140 = arith.addf %139, %132 : vector<1x128xf32>
    %141 = arith.divf %132, %140 : vector<1x128xf32>
    %142 = arith.select %134, %138, %141 : vector<1x128xi1>, vector<1x128xf32>
    %cst_45 = arith.constant 1.000000e-15 : f32
    %143 = vector.broadcast %cst_45 : f32 to vector<1x128xf32>
    %144 = arith.addf %142, %143 : vector<1x128xf32>
    %145 = math.log %144 : vector<1x128xf32>
    %cst_46 = arith.constant 0.000000e+00 : f32
    %146 = vector.broadcast %cst_46 : f32 to vector<1x128xf32>
    %147 = arith.subf %146, %145 : vector<1x128xf32>
    %cst_47 = arith.constant 0.000000e+00 : f32
    %148 = vector.broadcast %cst_47 : f32 to vector<1x128xf32>
    %149 = arith.select %120, %147, %148 : vector<1x128xi1>, vector<1x128xf32>
    %150 = arith.addf %101, %149 : vector<1x128xf32>
    %cst_48 = arith.constant 0.000000e+00 : f32
    %151 = vector.broadcast %cst_48 : f32 to vector<1x128xf32>
    %152 = arith.select %125, %147, %151 : vector<1x128xi1>, vector<1x128xf32>
    %153 = arith.addf %104, %152 : vector<1x128xf32>
    %c3 = arith.constant 3 : index
    %c0_49 = arith.constant 0 : index
    %154 = vector.load %arg2[%c3, %c0_49] : memref<8x256xi32, #tpu.memory_space<vmem>>, vector<1x256xi32>
    %155 = vector.broadcast %154 : vector<1x256xi32> to vector<16x256xi32>
    %156 = arith.cmpi eq, %1, %155 : vector<16x256xi32>
    %157 = arith.extui %156 : vector<16x256xi1> to vector<16x256xi32>
    %158 = arith.sitofp %157 : vector<16x256xi32> to vector<16x256xf32>
    %cst_50 = arith.constant dense<0.000000e+00> : vector<32x256xf32>
    %159 = tpu.matmul %0, %158, %cst_50 {dimension_numbers = #tpu.dot_dimension_numbers<[1], [0], [0], [1], [0, 0, 1, 1], [], []>} : vector<32x16xf32>, vector<16x256xf32>, vector<32x256xf32> -> vector<32x256xf32>
    %160 = vector.extract_strided_slice %159 {offsets = [0, 0], sizes = [32, 128], strides = [1, 1]} : vector<32x256xf32> to vector<32x128xf32>
    %161 = vector.extract_strided_slice %159 {offsets = [0, 128], sizes = [32, 128], strides = [1, 1]} : vector<32x256xf32> to vector<32x128xf32>
    %162 = arith.mulf %160, %161 : vector<32x128xf32>
    %cst_51 = arith.constant dense<0.000000e+00> : vector<128xf32>
    %163 = vector.multi_reduction <add>, %162, %cst_51 [0] : vector<32x128xf32> to vector<128xf32>
    %164 = vector.shape_cast %163 : vector<128xf32> to vector<1x128xf32>
    %c384_i32 = arith.constant 384 : i32
    %165 = arith.addi %6, %c384_i32 : i32
    %166 = vector.broadcast %165 : i32 to vector<1x128xi32>
    %167 = arith.addi %166, %2 : vector<1x128xi32>
    %c8_i32_52 = arith.constant 8 : i32
    %168 = vector.broadcast %c8_i32_52 : i32 to vector<1x128xi32>
    %169 = arith.cmpi slt, %167, %168 : vector<1x128xi32>
    %c8_i32_53 = arith.constant 8 : i32
    %170 = vector.broadcast %c8_i32_53 : i32 to vector<1x128xi32>
    %171 = arith.cmpi sge, %167, %170 : vector<1x128xi32>
    %c16_i32_54 = arith.constant 16 : i32
    %172 = vector.broadcast %c16_i32_54 : i32 to vector<1x128xi32>
    %173 = arith.cmpi slt, %167, %172 : vector<1x128xi32>
    %174 = arith.andi %171, %173 : vector<1x128xi1>
    %cst_55 = arith.constant 0.000000e+00 : f32
    %175 = vector.broadcast %cst_55 : f32 to vector<1x128xf32>
    %176 = arith.subf %175, %164 : vector<1x128xf32>
    %177 = arith.select %169, %164, %176 : vector<1x128xi1>, vector<1x128xf32>
    %178 = math.absf %177 : vector<1x128xf32>
    %cst_56 = arith.constant 0.000000e+00 : f32
    %179 = vector.broadcast %cst_56 : f32 to vector<1x128xf32>
    %180 = arith.subf %179, %178 : vector<1x128xf32>
    %181 = math.exp %180 : vector<1x128xf32>
    %cst_57 = arith.constant 0.000000e+00 : f32
    %182 = vector.broadcast %cst_57 : f32 to vector<1x128xf32>
    %183 = arith.cmpf oge, %177, %182 : vector<1x128xf32>
    %cst_58 = arith.constant 1.000000e+00 : f32
    %184 = vector.broadcast %cst_58 : f32 to vector<1x128xf32>
    %185 = arith.addf %184, %181 : vector<1x128xf32>
    %cst_59 = arith.constant 1.000000e+00 : f32
    %186 = vector.broadcast %cst_59 : f32 to vector<1x128xf32>
    %187 = arith.divf %186, %185 : vector<1x128xf32>
    %cst_60 = arith.constant 1.000000e+00 : f32
    %188 = vector.broadcast %cst_60 : f32 to vector<1x128xf32>
    %189 = arith.addf %188, %181 : vector<1x128xf32>
    %190 = arith.divf %181, %189 : vector<1x128xf32>
    %191 = arith.select %183, %187, %190 : vector<1x128xi1>, vector<1x128xf32>
    %cst_61 = arith.constant 1.000000e-15 : f32
    %192 = vector.broadcast %cst_61 : f32 to vector<1x128xf32>
    %193 = arith.addf %191, %192 : vector<1x128xf32>
    %194 = math.log %193 : vector<1x128xf32>
    %cst_62 = arith.constant 0.000000e+00 : f32
    %195 = vector.broadcast %cst_62 : f32 to vector<1x128xf32>
    %196 = arith.subf %195, %194 : vector<1x128xf32>
    %cst_63 = arith.constant 0.000000e+00 : f32
    %197 = vector.broadcast %cst_63 : f32 to vector<1x128xf32>
    %198 = arith.select %169, %196, %197 : vector<1x128xi1>, vector<1x128xf32>
    %199 = arith.addf %150, %198 : vector<1x128xf32>
    %cst_64 = arith.constant 0.000000e+00 : f32
    %200 = vector.broadcast %cst_64 : f32 to vector<1x128xf32>
    %201 = arith.select %174, %196, %200 : vector<1x128xi1>, vector<1x128xf32>
    %202 = arith.addf %153, %201 : vector<1x128xf32>
    %c4 = arith.constant 4 : index
    %c0_65 = arith.constant 0 : index
    %203 = vector.load %arg2[%c4, %c0_65] : memref<8x256xi32, #tpu.memory_space<vmem>>, vector<1x256xi32>
    %204 = vector.broadcast %203 : vector<1x256xi32> to vector<16x256xi32>
    %205 = arith.cmpi eq, %1, %204 : vector<16x256xi32>
    %206 = arith.extui %205 : vector<16x256xi1> to vector<16x256xi32>
    %207 = arith.sitofp %206 : vector<16x256xi32> to vector<16x256xf32>
    %cst_66 = arith.constant dense<0.000000e+00> : vector<32x256xf32>
    %208 = tpu.matmul %0, %207, %cst_66 {dimension_numbers = #tpu.dot_dimension_numbers<[1], [0], [0], [1], [0, 0, 1, 1], [], []>} : vector<32x16xf32>, vector<16x256xf32>, vector<32x256xf32> -> vector<32x256xf32>
    %209 = vector.extract_strided_slice %208 {offsets = [0, 0], sizes = [32, 128], strides = [1, 1]} : vector<32x256xf32> to vector<32x128xf32>
    %210 = vector.extract_strided_slice %208 {offsets = [0, 128], sizes = [32, 128], strides = [1, 1]} : vector<32x256xf32> to vector<32x128xf32>
    %211 = arith.mulf %209, %210 : vector<32x128xf32>
    %cst_67 = arith.constant dense<0.000000e+00> : vector<128xf32>
    %212 = vector.multi_reduction <add>, %211, %cst_67 [0] : vector<32x128xf32> to vector<128xf32>
    %213 = vector.shape_cast %212 : vector<128xf32> to vector<1x128xf32>
    %c512_i32 = arith.constant 512 : i32
    %214 = arith.addi %6, %c512_i32 : i32
    %215 = vector.broadcast %214 : i32 to vector<1x128xi32>
    %216 = arith.addi %215, %2 : vector<1x128xi32>
    %c8_i32_68 = arith.constant 8 : i32
    %217 = vector.broadcast %c8_i32_68 : i32 to vector<1x128xi32>
    %218 = arith.cmpi slt, %216, %217 : vector<1x128xi32>
    %c8_i32_69 = arith.constant 8 : i32
    %219 = vector.broadcast %c8_i32_69 : i32 to vector<1x128xi32>
    %220 = arith.cmpi sge, %216, %219 : vector<1x128xi32>
    %c16_i32_70 = arith.constant 16 : i32
    %221 = vector.broadcast %c16_i32_70 : i32 to vector<1x128xi32>
    %222 = arith.cmpi slt, %216, %221 : vector<1x128xi32>
    %223 = arith.andi %220, %222 : vector<1x128xi1>
    %cst_71 = arith.constant 0.000000e+00 : f32
    %224 = vector.broadcast %cst_71 : f32 to vector<1x128xf32>
    %225 = arith.subf %224, %213 : vector<1x128xf32>
    %226 = arith.select %218, %213, %225 : vector<1x128xi1>, vector<1x128xf32>
    %227 = math.absf %226 : vector<1x128xf32>
    %cst_72 = arith.constant 0.000000e+00 : f32
    %228 = vector.broadcast %cst_72 : f32 to vector<1x128xf32>
    %229 = arith.subf %228, %227 : vector<1x128xf32>
    %230 = math.exp %229 : vector<1x128xf32>
    %cst_73 = arith.constant 0.000000e+00 : f32
    %231 = vector.broadcast %cst_73 : f32 to vector<1x128xf32>
    %232 = arith.cmpf oge, %226, %231 : vector<1x128xf32>
    %cst_74 = arith.constant 1.000000e+00 : f32
    %233 = vector.broadcast %cst_74 : f32 to vector<1x128xf32>
    %234 = arith.addf %233, %230 : vector<1x128xf32>
    %cst_75 = arith.constant 1.000000e+00 : f32
    %235 = vector.broadcast %cst_75 : f32 to vector<1x128xf32>
    %236 = arith.divf %235, %234 : vector<1x128xf32>
    %cst_76 = arith.constant 1.000000e+00 : f32
    %237 = vector.broadcast %cst_76 : f32 to vector<1x128xf32>
    %238 = arith.addf %237, %230 : vector<1x128xf32>
    %239 = arith.divf %230, %238 : vector<1x128xf32>
    %240 = arith.select %232, %236, %239 : vector<1x128xi1>, vector<1x128xf32>
    %cst_77 = arith.constant 1.000000e-15 : f32
    %241 = vector.broadcast %cst_77 : f32 to vector<1x128xf32>
    %242 = arith.addf %240, %241 : vector<1x128xf32>
    %243 = math.log %242 : vector<1x128xf32>
    %cst_78 = arith.constant 0.000000e+00 : f32
    %244 = vector.broadcast %cst_78 : f32 to vector<1x128xf32>
    %245 = arith.subf %244, %243 : vector<1x128xf32>
    %cst_79 = arith.constant 0.000000e+00 : f32
    %246 = vector.broadcast %cst_79 : f32 to vector<1x128xf32>
    %247 = arith.select %218, %245, %246 : vector<1x128xi1>, vector<1x128xf32>
    %248 = arith.addf %199, %247 : vector<1x128xf32>
    %cst_80 = arith.constant 0.000000e+00 : f32
    %249 = vector.broadcast %cst_80 : f32 to vector<1x128xf32>
    %250 = arith.select %223, %245, %249 : vector<1x128xi1>, vector<1x128xf32>
    %251 = arith.addf %202, %250 : vector<1x128xf32>
    %c5 = arith.constant 5 : index
    %c0_81 = arith.constant 0 : index
    %252 = vector.load %arg2[%c5, %c0_81] : memref<8x256xi32, #tpu.memory_space<vmem>>, vector<1x256xi32>
    %253 = vector.broadcast %252 : vector<1x256xi32> to vector<16x256xi32>
    %254 = arith.cmpi eq, %1, %253 : vector<16x256xi32>
    %255 = arith.extui %254 : vector<16x256xi1> to vector<16x256xi32>
    %256 = arith.sitofp %255 : vector<16x256xi32> to vector<16x256xf32>
    %cst_82 = arith.constant dense<0.000000e+00> : vector<32x256xf32>
    %257 = tpu.matmul %0, %256, %cst_82 {dimension_numbers = #tpu.dot_dimension_numbers<[1], [0], [0], [1], [0, 0, 1, 1], [], []>} : vector<32x16xf32>, vector<16x256xf32>, vector<32x256xf32> -> vector<32x256xf32>
    %258 = vector.extract_strided_slice %257 {offsets = [0, 0], sizes = [32, 128], strides = [1, 1]} : vector<32x256xf32> to vector<32x128xf32>
    %259 = vector.extract_strided_slice %257 {offsets = [0, 128], sizes = [32, 128], strides = [1, 1]} : vector<32x256xf32> to vector<32x128xf32>
    %260 = arith.mulf %258, %259 : vector<32x128xf32>
    %cst_83 = arith.constant dense<0.000000e+00> : vector<128xf32>
    %261 = vector.multi_reduction <add>, %260, %cst_83 [0] : vector<32x128xf32> to vector<128xf32>
    %262 = vector.shape_cast %261 : vector<128xf32> to vector<1x128xf32>
    %c640_i32 = arith.constant 640 : i32
    %263 = arith.addi %6, %c640_i32 : i32
    %264 = vector.broadcast %263 : i32 to vector<1x128xi32>
    %265 = arith.addi %264, %2 : vector<1x128xi32>
    %c8_i32_84 = arith.constant 8 : i32
    %266 = vector.broadcast %c8_i32_84 : i32 to vector<1x128xi32>
    %267 = arith.cmpi slt, %265, %266 : vector<1x128xi32>
    %c8_i32_85 = arith.constant 8 : i32
    %268 = vector.broadcast %c8_i32_85 : i32 to vector<1x128xi32>
    %269 = arith.cmpi sge, %265, %268 : vector<1x128xi32>
    %c16_i32_86 = arith.constant 16 : i32
    %270 = vector.broadcast %c16_i32_86 : i32 to vector<1x128xi32>
    %271 = arith.cmpi slt, %265, %270 : vector<1x128xi32>
    %272 = arith.andi %269, %271 : vector<1x128xi1>
    %cst_87 = arith.constant 0.000000e+00 : f32
    %273 = vector.broadcast %cst_87 : f32 to vector<1x128xf32>
    %274 = arith.subf %273, %262 : vector<1x128xf32>
    %275 = arith.select %267, %262, %274 : vector<1x128xi1>, vector<1x128xf32>
    %276 = math.absf %275 : vector<1x128xf32>
    %cst_88 = arith.constant 0.000000e+00 : f32
    %277 = vector.broadcast %cst_88 : f32 to vector<1x128xf32>
    %278 = arith.subf %277, %276 : vector<1x128xf32>
    %279 = math.exp %278 : vector<1x128xf32>
    %cst_89 = arith.constant 0.000000e+00 : f32
    %280 = vector.broadcast %cst_89 : f32 to vector<1x128xf32>
    %281 = arith.cmpf oge, %275, %280 : vector<1x128xf32>
    %cst_90 = arith.constant 1.000000e+00 : f32
    %282 = vector.broadcast %cst_90 : f32 to vector<1x128xf32>
    %283 = arith.addf %282, %279 : vector<1x128xf32>
    %cst_91 = arith.constant 1.000000e+00 : f32
    %284 = vector.broadcast %cst_91 : f32 to vector<1x128xf32>
    %285 = arith.divf %284, %283 : vector<1x128xf32>
    %cst_92 = arith.constant 1.000000e+00 : f32
    %286 = vector.broadcast %cst_92 : f32 to vector<1x128xf32>
    %287 = arith.addf %286, %279 : vector<1x128xf32>
    %288 = arith.divf %279, %287 : vector<1x128xf32>
    %289 = arith.select %281, %285, %288 : vector<1x128xi1>, vector<1x128xf32>
    %cst_93 = arith.constant 1.000000e-15 : f32
    %290 = vector.broadcast %cst_93 : f32 to vector<1x128xf32>
    %291 = arith.addf %289, %290 : vector<1x128xf32>
    %292 = math.log %291 : vector<1x128xf32>
    %cst_94 = arith.constant 0.000000e+00 : f32
    %293 = vector.broadcast %cst_94 : f32 to vector<1x128xf32>
    %294 = arith.subf %293, %292 : vector<1x128xf32>
    %cst_95 = arith.constant 0.000000e+00 : f32
    %295 = vector.broadcast %cst_95 : f32 to vector<1x128xf32>
    %296 = arith.select %267, %294, %295 : vector<1x128xi1>, vector<1x128xf32>
    %297 = arith.addf %248, %296 : vector<1x128xf32>
    %cst_96 = arith.constant 0.000000e+00 : f32
    %298 = vector.broadcast %cst_96 : f32 to vector<1x128xf32>
    %299 = arith.select %272, %294, %298 : vector<1x128xi1>, vector<1x128xf32>
    %300 = arith.addf %251, %299 : vector<1x128xf32>
    %c6 = arith.constant 6 : index
    %c0_97 = arith.constant 0 : index
    %301 = vector.load %arg2[%c6, %c0_97] : memref<8x256xi32, #tpu.memory_space<vmem>>, vector<1x256xi32>
    %302 = vector.broadcast %301 : vector<1x256xi32> to vector<16x256xi32>
    %303 = arith.cmpi eq, %1, %302 : vector<16x256xi32>
    %304 = arith.extui %303 : vector<16x256xi1> to vector<16x256xi32>
    %305 = arith.sitofp %304 : vector<16x256xi32> to vector<16x256xf32>
    %cst_98 = arith.constant dense<0.000000e+00> : vector<32x256xf32>
    %306 = tpu.matmul %0, %305, %cst_98 {dimension_numbers = #tpu.dot_dimension_numbers<[1], [0], [0], [1], [0, 0, 1, 1], [], []>} : vector<32x16xf32>, vector<16x256xf32>, vector<32x256xf32> -> vector<32x256xf32>
    %307 = vector.extract_strided_slice %306 {offsets = [0, 0], sizes = [32, 128], strides = [1, 1]} : vector<32x256xf32> to vector<32x128xf32>
    %308 = vector.extract_strided_slice %306 {offsets = [0, 128], sizes = [32, 128], strides = [1, 1]} : vector<32x256xf32> to vector<32x128xf32>
    %309 = arith.mulf %307, %308 : vector<32x128xf32>
    %cst_99 = arith.constant dense<0.000000e+00> : vector<128xf32>
    %310 = vector.multi_reduction <add>, %309, %cst_99 [0] : vector<32x128xf32> to vector<128xf32>
    %311 = vector.shape_cast %310 : vector<128xf32> to vector<1x128xf32>
    %c768_i32 = arith.constant 768 : i32
    %312 = arith.addi %6, %c768_i32 : i32
    %313 = vector.broadcast %312 : i32 to vector<1x128xi32>
    %314 = arith.addi %313, %2 : vector<1x128xi32>
    %c8_i32_100 = arith.constant 8 : i32
    %315 = vector.broadcast %c8_i32_100 : i32 to vector<1x128xi32>
    %316 = arith.cmpi slt, %314, %315 : vector<1x128xi32>
    %c8_i32_101 = arith.constant 8 : i32
    %317 = vector.broadcast %c8_i32_101 : i32 to vector<1x128xi32>
    %318 = arith.cmpi sge, %314, %317 : vector<1x128xi32>
    %c16_i32_102 = arith.constant 16 : i32
    %319 = vector.broadcast %c16_i32_102 : i32 to vector<1x128xi32>
    %320 = arith.cmpi slt, %314, %319 : vector<1x128xi32>
    %321 = arith.andi %318, %320 : vector<1x128xi1>
    %cst_103 = arith.constant 0.000000e+00 : f32
    %322 = vector.broadcast %cst_103 : f32 to vector<1x128xf32>
    %323 = arith.subf %322, %311 : vector<1x128xf32>
    %324 = arith.select %316, %311, %323 : vector<1x128xi1>, vector<1x128xf32>
    %325 = math.absf %324 : vector<1x128xf32>
    %cst_104 = arith.constant 0.000000e+00 : f32
    %326 = vector.broadcast %cst_104 : f32 to vector<1x128xf32>
    %327 = arith.subf %326, %325 : vector<1x128xf32>
    %328 = math.exp %327 : vector<1x128xf32>
    %cst_105 = arith.constant 0.000000e+00 : f32
    %329 = vector.broadcast %cst_105 : f32 to vector<1x128xf32>
    %330 = arith.cmpf oge, %324, %329 : vector<1x128xf32>
    %cst_106 = arith.constant 1.000000e+00 : f32
    %331 = vector.broadcast %cst_106 : f32 to vector<1x128xf32>
    %332 = arith.addf %331, %328 : vector<1x128xf32>
    %cst_107 = arith.constant 1.000000e+00 : f32
    %333 = vector.broadcast %cst_107 : f32 to vector<1x128xf32>
    %334 = arith.divf %333, %332 : vector<1x128xf32>
    %cst_108 = arith.constant 1.000000e+00 : f32
    %335 = vector.broadcast %cst_108 : f32 to vector<1x128xf32>
    %336 = arith.addf %335, %328 : vector<1x128xf32>
    %337 = arith.divf %328, %336 : vector<1x128xf32>
    %338 = arith.select %330, %334, %337 : vector<1x128xi1>, vector<1x128xf32>
    %cst_109 = arith.constant 1.000000e-15 : f32
    %339 = vector.broadcast %cst_109 : f32 to vector<1x128xf32>
    %340 = arith.addf %338, %339 : vector<1x128xf32>
    %341 = math.log %340 : vector<1x128xf32>
    %cst_110 = arith.constant 0.000000e+00 : f32
    %342 = vector.broadcast %cst_110 : f32 to vector<1x128xf32>
    %343 = arith.subf %342, %341 : vector<1x128xf32>
    %cst_111 = arith.constant 0.000000e+00 : f32
    %344 = vector.broadcast %cst_111 : f32 to vector<1x128xf32>
    %345 = arith.select %316, %343, %344 : vector<1x128xi1>, vector<1x128xf32>
    %346 = arith.addf %297, %345 : vector<1x128xf32>
    %cst_112 = arith.constant 0.000000e+00 : f32
    %347 = vector.broadcast %cst_112 : f32 to vector<1x128xf32>
    %348 = arith.select %321, %343, %347 : vector<1x128xi1>, vector<1x128xf32>
    %349 = arith.addf %300, %348 : vector<1x128xf32>
    %c7 = arith.constant 7 : index
    %c0_113 = arith.constant 0 : index
    %350 = vector.load %arg2[%c7, %c0_113] : memref<8x256xi32, #tpu.memory_space<vmem>>, vector<1x256xi32>
    %351 = vector.broadcast %350 : vector<1x256xi32> to vector<16x256xi32>
    %352 = arith.cmpi eq, %1, %351 : vector<16x256xi32>
    %353 = arith.extui %352 : vector<16x256xi1> to vector<16x256xi32>
    %354 = arith.sitofp %353 : vector<16x256xi32> to vector<16x256xf32>
    %cst_114 = arith.constant dense<0.000000e+00> : vector<32x256xf32>
    %355 = tpu.matmul %0, %354, %cst_114 {dimension_numbers = #tpu.dot_dimension_numbers<[1], [0], [0], [1], [0, 0, 1, 1], [], []>} : vector<32x16xf32>, vector<16x256xf32>, vector<32x256xf32> -> vector<32x256xf32>
    %356 = vector.extract_strided_slice %355 {offsets = [0, 0], sizes = [32, 128], strides = [1, 1]} : vector<32x256xf32> to vector<32x128xf32>
    %357 = vector.extract_strided_slice %355 {offsets = [0, 128], sizes = [32, 128], strides = [1, 1]} : vector<32x256xf32> to vector<32x128xf32>
    %358 = arith.mulf %356, %357 : vector<32x128xf32>
    %cst_115 = arith.constant dense<0.000000e+00> : vector<128xf32>
    %359 = vector.multi_reduction <add>, %358, %cst_115 [0] : vector<32x128xf32> to vector<128xf32>
    %360 = vector.shape_cast %359 : vector<128xf32> to vector<1x128xf32>
    %c896_i32 = arith.constant 896 : i32
    %361 = arith.addi %6, %c896_i32 : i32
    %362 = vector.broadcast %361 : i32 to vector<1x128xi32>
    %363 = arith.addi %362, %2 : vector<1x128xi32>
    %c8_i32_116 = arith.constant 8 : i32
    %364 = vector.broadcast %c8_i32_116 : i32 to vector<1x128xi32>
    %365 = arith.cmpi slt, %363, %364 : vector<1x128xi32>
    %c8_i32_117 = arith.constant 8 : i32
    %366 = vector.broadcast %c8_i32_117 : i32 to vector<1x128xi32>
    %367 = arith.cmpi sge, %363, %366 : vector<1x128xi32>
    %c16_i32_118 = arith.constant 16 : i32
    %368 = vector.broadcast %c16_i32_118 : i32 to vector<1x128xi32>
    %369 = arith.cmpi slt, %363, %368 : vector<1x128xi32>
    %370 = arith.andi %367, %369 : vector<1x128xi1>
    %cst_119 = arith.constant 0.000000e+00 : f32
    %371 = vector.broadcast %cst_119 : f32 to vector<1x128xf32>
    %372 = arith.subf %371, %360 : vector<1x128xf32>
    %373 = arith.select %365, %360, %372 : vector<1x128xi1>, vector<1x128xf32>
    %374 = math.absf %373 : vector<1x128xf32>
    %cst_120 = arith.constant 0.000000e+00 : f32
    %375 = vector.broadcast %cst_120 : f32 to vector<1x128xf32>
    %376 = arith.subf %375, %374 : vector<1x128xf32>
    %377 = math.exp %376 : vector<1x128xf32>
    %cst_121 = arith.constant 0.000000e+00 : f32
    %378 = vector.broadcast %cst_121 : f32 to vector<1x128xf32>
    %379 = arith.cmpf oge, %373, %378 : vector<1x128xf32>
    %cst_122 = arith.constant 1.000000e+00 : f32
    %380 = vector.broadcast %cst_122 : f32 to vector<1x128xf32>
    %381 = arith.addf %380, %377 : vector<1x128xf32>
    %cst_123 = arith.constant 1.000000e+00 : f32
    %382 = vector.broadcast %cst_123 : f32 to vector<1x128xf32>
    %383 = arith.divf %382, %381 : vector<1x128xf32>
    %cst_124 = arith.constant 1.000000e+00 : f32
    %384 = vector.broadcast %cst_124 : f32 to vector<1x128xf32>
    %385 = arith.addf %384, %377 : vector<1x128xf32>
    %386 = arith.divf %377, %385 : vector<1x128xf32>
    %387 = arith.select %379, %383, %386 : vector<1x128xi1>, vector<1x128xf32>
    %cst_125 = arith.constant 1.000000e-15 : f32
    %388 = vector.broadcast %cst_125 : f32 to vector<1x128xf32>
    %389 = arith.addf %387, %388 : vector<1x128xf32>
    %390 = math.log %389 : vector<1x128xf32>
    %cst_126 = arith.constant 0.000000e+00 : f32
    %391 = vector.broadcast %cst_126 : f32 to vector<1x128xf32>
    %392 = arith.subf %391, %390 : vector<1x128xf32>
    %cst_127 = arith.constant 0.000000e+00 : f32
    %393 = vector.broadcast %cst_127 : f32 to vector<1x128xf32>
    %394 = arith.select %365, %392, %393 : vector<1x128xi1>, vector<1x128xf32>
    %395 = arith.addf %346, %394 : vector<1x128xf32>
    %cst_128 = arith.constant 0.000000e+00 : f32
    %396 = vector.broadcast %cst_128 : f32 to vector<1x128xf32>
    %397 = arith.select %370, %392, %396 : vector<1x128xi1>, vector<1x128xf32>
    %398 = arith.addf %349, %397 : vector<1x128xf32>
    %c0_i32_129 = arith.constant 0 : i32
    %399 = vector.broadcast %c0_i32_129 : i32 to vector<8x128xi32>
    %400 = arith.cmpi eq, %3, %399 : vector<8x128xi32>
    %cst_130 = arith.constant 0.000000e+00 : f32
    %401 = vector.shape_cast %395 : vector<1x128xf32> to vector<1x128xf32>
    %402 = vector.broadcast %401 : vector<1x128xf32> to vector<8x128xf32>
    %403 = vector.broadcast %cst_130 : f32 to vector<8x128xf32>
    %404 = arith.select %400, %402, %403 : vector<8x128xi1>, vector<8x128xf32>
    %c1_i32 = arith.constant 1 : i32
    %405 = vector.broadcast %c1_i32 : i32 to vector<8x128xi32>
    %406 = arith.cmpi eq, %3, %405 : vector<8x128xi32>
    %cst_131 = arith.constant 0.000000e+00 : f32
    %407 = vector.shape_cast %398 : vector<1x128xf32> to vector<1x128xf32>
    %408 = vector.broadcast %407 : vector<1x128xf32> to vector<8x128xf32>
    %409 = vector.broadcast %cst_131 : f32 to vector<8x128xf32>
    %410 = arith.select %406, %408, %409 : vector<8x128xi1>, vector<8x128xf32>
    %411 = arith.addf %404, %410 : vector<8x128xf32>
    %c0_132 = arith.constant 0 : index
    %c0_133 = arith.constant 0 : index
    %412 = vector.load %arg3[%c0_132, %c0_133] : memref<8x128xf32, #tpu.memory_space<vmem>>, vector<8x128xf32>
    tpu.vector_store %arg3[%c0_132, %c0_133], %411 {strides = array<i32>} : memref<8x128xf32, #tpu.memory_space<vmem>>, vector<8x128xf32>,
    return
  }
  func.func @transform_0(%arg0: i32) -> (i32, i32) {
    %c0_i32 = arith.constant 0 : i32
    %c0_i32_0 = arith.constant 0 : i32
    %c0_i32_1 = arith.constant 0 : i32
    return %c0_i32, %c0_i32_0 : i32, i32
  }
  func.func @transform_1(%arg0: i32) -> (i32, i32) {
    %c0_i32 = arith.constant 0 : i32
    %c0_i32_0 = arith.constant 0 : i32
    return %arg0, %c0_i32 : i32, i32
  }
  func.func @transform_2(%arg0: i32) -> (i32, i32) {
    %c0_i32 = arith.constant 0 : i32
    %c0_i32_0 = arith.constant 0 : i32
    return %arg0, %c0_i32 : i32, i32
  }
}

</mosaic_0001>

<bundles_post_ra>
// kernel: tpu_custom_call.1
= control target key start
LH: loop header
LB: loop body
LE: loop exit
PB: predicated region body
PF: predicated region fallthrough
CT: control target
= control target key end

     0   :  { %v16_v0 = vlaneseq  ;;  %s1556_s0 = inlined_call_operand.vmem [shape: f32[32,16], index: 0, kind: input, shape index: {}]   ;;  %s1557_s1 = inlined_call_operand.vmem [shape: s32[8,256], index: 1, kind: input, shape index: {}]   ;;  %s1558_s2 = inlined_call_operand.hbm [shape: f32[8,128], index: 2, kind: output, shape index: {}]  }
   0x1   :  { %v22_v1 = vld [vmem:[%s1557_s1] ss:$8 sm:$0x3]  ;;  %v1087_v4 = vld [vmem:[%s1557_s1 + $0x1] ss:$8 sm:$0x3] }
   0x2   :  { %v23_v2 = vperm.slane %v22_v1, 0  ;;  %v24_v3 = vperm.slane %v22_v1, 1  ;;  %v1264_v5 = vshrl.u32 %v16_v0, 7  ;;  %v162_v6 = vperm.slane %v1087_v4, 0 }
   0x3   :  { %v163_v7 = vperm.slane %v1087_v4, 1  ;;  %v1121_v8 = vld [vmem:[%s1557_s1 + $0x3] ss:$8 sm:$0x3] }
   0x4   :  { %v1270_v9 = vadd.s32 8, %v1264_v5  ;;  %v1104_v10 = vld [vmem:[%s1557_s1 + $0x2] ss:$8 sm:$0x3] }
   0x5   :  { %7 = vsyncpa [#allocation3], 0  ;;  %vm1276_vm0 = vcmp.eq.s32.totalorder %v1264_v5, %v23_v2  ;;  %vm1281_vm1 = vcmp.eq.s32.totalorder %v1264_v5, %v24_v3  ;;  %v416_v13 = vperm.slane %v1121_v8, 0  ;;  %v417_v14 = vperm.slane %v1121_v8, 1  ;;  %v1298_v18 = vld [vmem:[%s1556_s0] sm:$0xff]  ;;  %v1368_v30 = vld [vmem:[%s1556_s0 + $0x8] sm:$0xff] }
   0x6   :  { %vm27_vm2 = vcmp.eq.s32.totalorder %v1270_v9, %v23_v2  ;;  %vm28_vm3 = vcmp.eq.s32.totalorder %v1270_v9, %v24_v3  ;;  %vm166_vm4 = vcmp.eq.s32.totalorder %v1270_v9, %v162_v6  ;;  %vm167_vm5 = vcmp.eq.s32.totalorder %v1270_v9, %v163_v7  ;;  %v1155_v24 = vld [vmem:[%s1557_s1 + $0x5] ss:$8 sm:$0x3]  ;;  %v1138_v25 = vld [vmem:[%s1557_s1 + $0x4] ss:$8 sm:$0x3] }
   0x7   :  { %v1240_v15 = vmov 1.0   ;;  %vm164_vm6 = vcmp.eq.s32.totalorder %v1264_v5, %v162_v6  ;;  %vm165_vm7 = vcmp.eq.s32.totalorder %v1264_v5, %v163_v7  ;;  %v289_v16 = vperm.slane %v1104_v10, 0  ;;  %v1392_v31 = vld [vmem:[%s1556_s0 + $0x10] sm:$0xff]  ;;  %v1413_v32 = vld [vmem:[%s1556_s0 + $0x18] sm:$0xff]  ;;  %s1062_s7 = sshll.u32 %s1558_s2, 4  ;;  %s1063_s7 = int_to_ptr.hbm [resolvable:$true] %s1062_s7 }
   0x8   :  { %1075 = vmatpush.msk.msra.mxu0 %vm27_vm2, %v1240_v15  ;;  %1081 = vmatpush.msk.msra.mxu1 %vm28_vm3, %v1240_v15  ;;  %v290_v17 = vperm.slane %v1104_v10, 1  ;;  %vm37_vm8 = vcmask 130048   ;;  %vm420_vm9 = vcmp.eq.s32.totalorder %v1270_v9, %v416_v13  ;;  %vm421_vm10 = vcmp.eq.s32.totalorder %v1270_v9, %v417_v14  ;;  %v1189_v33 = vld [vmem:[%s1557_s1 + $0x7] ss:$8 sm:$0x3] }
   0x9   :  { %1092 = vmatpush.msk.msra.mxu2 %vm166_vm4, %v1240_v15  ;;  %1098 = vmatpush.msk.msra.mxu3 %vm167_vm5, %v1240_v15  ;;  %vm1315_vm11 = vcmp.eq.s32.totalorder %v1270_v9, %v289_v16  ;;  %vm1325_vm13 = vcmp.eq.s32.totalorder %v1264_v5, %v416_v13  ;;  %vm419_vm14 = vcmp.eq.s32.totalorder %v1264_v5, %v417_v14  ;;  %v670_v26 = vperm.slane %v1155_v24, 0  ;;  %v1172_v34 = vld [vmem:[%s1557_s1 + $0x6] ss:$8 sm:$0x3]  ;;  %s1241_s1 = smov [#allocation2]  }
   0xa   :  { %1076 = vmatpush.msk.msra.mxu0 %vm1276_vm0, %v1240_v15  ;;  %1082 = vmatpush.msk.msra.mxu1 %vm1281_vm1, %v1240_v15  ;;  %vm1320_vm12 = vcmp.eq.s32.totalorder %v1270_v9, %v290_v17  ;;  %vm1335_vm15 = vcmp.eq.s32.totalorder %v1264_v5, %v289_v16  ;;  %vm1340_vm0 = vcmp.eq.s32.totalorder %v1264_v5, %v290_v17  ;;  %v671_v27 = vperm.slane %v1155_v24, 1  ;;  %s1060_s4 = sshll.u32 %s1241_s1, 4  ;;  %s1061_s4 = int_to_ptr.vmem [resolvable:$true] %s1060_s4 }
   0xb   :  { %1093 = vmatpush.msk.msra.mxu2 %vm164_vm6, %v1240_v15  ;;  %1099 = vmatpush.msk.msra.mxu3 %vm165_vm7, %v1240_v15  ;;  %v543_v28 = vperm.slane %v1138_v25, 0  ;;  %v544_v29 = vperm.slane %v1138_v25, 1  ;;  %vm674_vm1 = vcmp.eq.s32.totalorder %v1270_v9, %v670_v26  ;;  %vm672_vm5 = vcmp.eq.s32.totalorder %v1264_v5, %v670_v26 }
   0xc   :  { %1077 = vmatmul.msk.f32.vlgmr.msra.gmra.mxu0 %vm37_vm8, %v1298_v18  ;;  %1083 = vmatmul.msk.f32.vlgmr.msra.gmra.mxu1 %vm37_vm8, %v1298_v18  ;;  %vm675_vm2 = vcmp.eq.s32.totalorder %v1270_v9, %v671_v27  ;;  %vm673_vm6 = vcmp.eq.s32.totalorder %v1264_v5, %v671_v27  ;;  %v924_v35 = vperm.slane %v1189_v33, 0  ;;  %v925_v36 = vperm.slane %v1189_v33, 1 }
   0xd   :  { %1094 = vmatmul.msk.f32.vlgmr.msra.gmra.mxu2 %vm37_vm8, %v1298_v18  ;;  %1100 = vmatmul.msk.f32.vlgmr.msra.gmra.mxu3 %vm37_vm8, %v1298_v18  ;;  %vm547_vm3 = vcmp.eq.s32.totalorder %v1270_v9, %v543_v28  ;;  %vm548_vm4 = vcmp.eq.s32.totalorder %v1270_v9, %v544_v29  ;;  %vm545_vm7 = vcmp.eq.s32.totalorder %v1264_v5, %v543_v28  ;;  %v797_v37 = vperm.slane %v1172_v34, 0 }
   0xe   :  { %1126 = vmatpush.msk.msrb.mxu2 %vm420_vm9, %v1240_v15  ;;  %1132 = vmatpush.msk.msrb.mxu3 %vm421_vm10, %v1240_v15  ;;  %vm546_vm9 = vcmp.eq.s32.totalorder %v1264_v5, %v544_v29  ;;  %v798_v38 = vperm.slane %v1172_v34, 1  ;;  %vm928_vm10 = vcmp.eq.s32.totalorder %v1270_v9, %v924_v35  ;;  %v1542_v6 = vand.u32 127, %v16_v0 }
   0xf   :  { %1109 = vmatpush.msk.msrb.mxu0 %vm1315_vm11, %v1240_v15  ;;  %1115 = vmatpush.msk.msrb.mxu1 %vm1320_vm12, %v1240_v15  ;;  %vm929_vm11 = vcmp.eq.s32.totalorder %v1270_v9, %v925_v36  ;;  %vm801_vm12 = vcmp.eq.s32.totalorder %v1270_v9, %v797_v37 }
  0x10   :  { %1127 = vmatpush.msk.msrb.mxu2 %vm1325_vm13, %v1240_v15  ;;  %1133 = vmatpush.msk.msrb.mxu3 %vm419_vm14, %v1240_v15  ;;  %vm802_vm13 = vcmp.eq.s32.totalorder %v1270_v9, %v798_v38  ;;  %vm926_vm14 = vcmp.eq.s32.totalorder %v1264_v5, %v924_v35 }
  0x11   :  { %1110 = vmatpush.msk.msrb.mxu0 %vm1335_vm15, %v1240_v15  ;;  %1116 = vmatpush.msk.msrb.mxu1 %vm1340_vm0, %v1240_v15  ;;  %vm927_vm15 = vcmp.eq.s32.totalorder %v1264_v5, %v925_v36  ;;  %vm799_vm0 = vcmp.eq.s32.totalorder %v1264_v5, %v797_v37 }
  0x12   :  { %1160 = vmatpush.msk.msra.mxu2 %vm674_vm1, %v1240_v15  ;;  %1166 = vmatpush.msk.msra.mxu3 %vm675_vm2, %v1240_v15  ;;  %vm800_vm1 = vcmp.eq.s32.totalorder %v1264_v5, %v798_v38 }
  0x13   :  { %1143 = vmatpush.msk.msra.mxu0 %vm547_vm3, %v1240_v15  ;;  %1149 = vmatpush.msk.msra.mxu1 %vm548_vm4, %v1240_v15 }
  0x14   :  { %1078 = vmatmul.msk.f32.gmra.mxu0 %vm37_vm8, %v1368_v30  ;;  %1084 = vmatmul.msk.f32.gmra.mxu1 %vm37_vm8, %v1368_v30 }
  0x15   :  { %1095 = vmatmul.msk.f32.gmra.mxu2 %vm37_vm8, %v1368_v30  ;;  %1101 = vmatmul.msk.f32.gmra.mxu3 %vm37_vm8, %v1368_v30 }
  0x16   :  { %1161 = vmatpush.msk.msra.mxu2 %vm672_vm5, %v1240_v15  ;;  %1167 = vmatpush.msk.msra.mxu3 %vm673_vm6, %v1240_v15 }
  0x17   :  { %1144 = vmatpush.msk.msra.mxu0 %vm545_vm7, %v1240_v15  ;;  %1150 = vmatpush.msk.msra.mxu1 %vm546_vm9, %v1240_v15  ;;  %vm124_vm7 = vcmp.ge.s32.totalorder %v1542_v6, 8  ;;  %vm125_vm9 = vcmp.lt.s32.totalorder %v1542_v6, 16 }
  0x1c   :  { %1079 = vmatmul.msk.f32.gmra.mxu0 %vm37_vm8, %v1392_v31  ;;  %1085 = vmatmul.msk.f32.gmra.mxu1 %vm37_vm8, %v1392_v31 }
  0x1d   :  { %1096 = vmatmul.msk.f32.gmra.mxu2 %vm37_vm8, %v1392_v31  ;;  %1102 = vmatmul.msk.f32.gmra.mxu3 %vm37_vm8, %v1392_v31 }
  0x24   :  { %1080 = vmatmul.msk.f32.gmra.mxu0 %vm37_vm8, %v1413_v32  ;;  %1086 = vmatmul.msk.f32.gmra.mxu1 %vm37_vm8, %v1413_v32 }
  0x25   :  { %1097 = vmatmul.msk.f32.gmra.mxu2 %vm37_vm8, %v1413_v32  ;;  %1103 = vmatmul.msk.f32.gmra.mxu3 %vm37_vm8, %v1413_v32 }
  0x2c   :  { %1111 = vmatmul.msk.f32.vlgmr.msrb.gmra.mxu0 %vm37_vm8, %v1298_v18  ;;  %1117 = vmatmul.msk.f32.vlgmr.msrb.gmra.mxu1 %vm37_vm8, %v1298_v18 }
  0x2d   :  { %1128 = vmatmul.msk.f32.vlgmr.msrb.gmra.mxu2 %vm37_vm8, %v1298_v18  ;;  %1134 = vmatmul.msk.f32.vlgmr.msrb.gmra.mxu3 %vm37_vm8, %v1298_v18 }
  0x2e   :  { %1194 = vmatpush.msk.msrb.mxu2 %vm928_vm10, %v1240_v15  ;;  %1200 = vmatpush.msk.msrb.mxu3 %vm929_vm11, %v1240_v15  ;;  %vm126_vm10 = vmand %vm124_vm7, %vm125_vm9  ;;  %vm1049_vm11 = vcmp.eq.s32.totalorder %v1264_v5, 0 }
  0x2f   :  { %1177 = vmatpush.msk.msrb.mxu0 %vm801_vm12, %v1240_v15  ;;  %1183 = vmatpush.msk.msrb.mxu1 %vm802_vm13, %v1240_v15  ;;  %vm1051_vm12 = vcmp.eq.s32.totalorder %v1264_v5, 1 }
  0x30   :  { %1195 = vmatpush.msk.msrb.mxu2 %vm926_vm14, %v1240_v15  ;;  %1201 = vmatpush.msk.msrb.mxu3 %vm927_vm15, %v1240_v15 }
  0x31   :  { %1178 = vmatpush.msk.msrb.mxu0 %vm799_vm0, %v1240_v15  ;;  %1184 = vmatpush.msk.msrb.mxu1 %vm800_vm1, %v1240_v15 }
  0x34   :  { %1112 = vmatmul.msk.f32.gmra.mxu0 %vm37_vm8, %v1368_v30  ;;  %1118 = vmatmul.msk.f32.gmra.mxu1 %vm37_vm8, %v1368_v30 }
  0x35   :  { %1129 = vmatmul.msk.f32.gmra.mxu2 %vm37_vm8, %v1368_v30  ;;  %1135 = vmatmul.msk.f32.gmra.mxu3 %vm37_vm8, %v1368_v30 }
  0x3c   :  { %1113 = vmatmul.msk.f32.gmra.mxu0 %vm37_vm8, %v1392_v31  ;;  %1119 = vmatmul.msk.f32.gmra.mxu1 %vm37_vm8, %v1392_v31 }
  0x3d   :  { %1130 = vmatmul.msk.f32.gmra.mxu2 %vm37_vm8, %v1392_v31  ;;  %1136 = vmatmul.msk.f32.gmra.mxu3 %vm37_vm8, %v1392_v31 }
  0x44   :  { %1114 = vmatmul.msk.f32.gmra.mxu0 %vm37_vm8, %v1413_v32  ;;  %1120 = vmatmul.msk.f32.gmra.mxu1 %vm37_vm8, %v1413_v32 }
  0x45   :  { %1131 = vmatmul.msk.f32.gmra.mxu2 %vm37_vm8, %v1413_v32  ;;  %1137 = vmatmul.msk.f32.gmra.mxu3 %vm37_vm8, %v1413_v32 }
  0x4c   :  { %1145 = vmatmul.msk.f32.vlgmr.msra.gmra.mxu0 %vm37_vm8, %v1298_v18  ;;  %1151 = vmatmul.msk.f32.vlgmr.msra.gmra.mxu1 %vm37_vm8, %v1298_v18 }
  0x4d   :  { %1162 = vmatmul.msk.f32.vlgmr.msra.gmra.mxu2 %vm37_vm8, %v1298_v18  ;;  %1168 = vmatmul.msk.f32.vlgmr.msra.gmra.mxu3 %vm37_vm8, %v1298_v18 }
  0x54   :  { %1146 = vmatmul.msk.f32.gmra.mxu0 %vm37_vm8, %v1368_v30  ;;  %1152 = vmatmul.msk.f32.gmra.mxu1 %vm37_vm8, %v1368_v30 }
  0x55   :  { %1163 = vmatmul.msk.f32.gmra.mxu2 %vm37_vm8, %v1368_v30  ;;  %1169 = vmatmul.msk.f32.gmra.mxu3 %vm37_vm8, %v1368_v30 }
  0x5c   :  { %1147 = vmatmul.msk.f32.gmra.mxu0 %vm37_vm8, %v1392_v31  ;;  %1153 = vmatmul.msk.f32.gmra.mxu1 %vm37_vm8, %v1392_v31 }
  0x5d   :  { %1164 = vmatmul.msk.f32.gmra.mxu2 %vm37_vm8, %v1392_v31  ;;  %1170 = vmatmul.msk.f32.gmra.mxu3 %vm37_vm8, %v1392_v31 }
  0x64   :  { %1148 = vmatmul.msk.f32.gmra.mxu0 %vm37_vm8, %v1413_v32  ;;  %1154 = vmatmul.msk.f32.gmra.mxu1 %vm37_vm8, %v1413_v32 }
  0x65   :  { %1165 = vmatmul.msk.f32.gmra.mxu2 %vm37_vm8, %v1413_v32  ;;  %1171 = vmatmul.msk.f32.gmra.mxu3 %vm37_vm8, %v1413_v32 }
  0x6c   :  { %1179 = vmatmul.msk.f32.vlgmr.msrb.gmra.mxu0 %vm37_vm8, %v1298_v18  ;;  %1185 = vmatmul.msk.f32.vlgmr.msrb.gmra.mxu1 %vm37_vm8, %v1298_v18 }
  0x6d   :  { %1196 = vmatmul.msk.f32.vlgmr.msrb.gmra.mxu2 %vm37_vm8, %v1298_v18  ;;  %1202 = vmatmul.msk.f32.vlgmr.msrb.gmra.mxu3 %vm37_vm8, %v1298_v18 }
  0x74   :  { %1180 = vmatmul.msk.f32.gmra.mxu0 %vm37_vm8, %v1368_v30  ;;  %1186 = vmatmul.msk.f32.gmra.mxu1 %vm37_vm8, %v1368_v30 }
  0x75   :  { %1197 = vmatmul.msk.f32.gmra.mxu2 %vm37_vm8, %v1368_v30  ;;  %1203 = vmatmul.msk.f32.gmra.mxu3 %vm37_vm8, %v1368_v30 }
  0x7c   :  { %1181 = vmatmul.msk.f32.gmra.mxu0 %vm37_vm8, %v1392_v31  ;;  %1187 = vmatmul.msk.f32.gmra.mxu1 %vm37_vm8, %v1392_v31 }
  0x7d   :  { %1198 = vmatmul.msk.f32.gmra.mxu2 %vm37_vm8, %v1392_v31  ;;  %1204 = vmatmul.msk.f32.gmra.mxu3 %vm37_vm8, %v1392_v31 }
  0x84   :  { %1182 = vmatmul.msk.f32.gmra.mxu0 %vm37_vm8, %v1413_v32  ;;  %1188 = vmatmul.msk.f32.gmra.mxu1 %vm37_vm8, %v1413_v32 }
  0x85   :  { %1199 = vmatmul.msk.f32.gmra.mxu2 %vm37_vm8, %v1413_v32  ;;  %1205 = vmatmul.msk.f32.gmra.mxu3 %vm37_vm8, %v1413_v32  ;;  %vm123_vm8 = vcmp.lt.s32.totalorder %v1542_v6, 8 }
  0x89   :  { %v67_v39 = vpop.f32.mrf.mxu0  ;;  %v96_v40 = vpop.f32.mrf.mxu1 }
  0x8a   :  { %v108_v50 = vmul.f32 %v96_v40, %v67_v39 }
  0x90   :  { %v193_v41 = vpop.f32.mrf.mxu2  ;;  %v222_v42 = vpop.f32.mrf.mxu3 }
  0x91   :  { %v70_v43 = vpop.f32.mrf.mxu0  ;;  %v99_v44 = vpop.f32.mrf.mxu1 }
  0x92   :  { %v109_v49 = vmul.f32 %v99_v44, %v70_v43 }
  0x94   :  { %v112_v52 = vadd.f32 %v109_v49, %v108_v50 }
  0x98   :  { %v196_v45 = vpop.f32.mrf.mxu2  ;;  %v225_v46 = vpop.f32.mrf.mxu3 }
  0x99   :  { %v73_v47 = vpop.f32.mrf.mxu0  ;;  %v102_v48 = vpop.f32.mrf.mxu1 }
  0x9a   :  { %v110_v51 = vmul.f32 %v102_v48, %v73_v47 }
  0x9c   :  { %v113_v57 = vadd.f32 %v112_v52, %v110_v51 }
  0xa0   :  { %v199_v53 = vpop.f32.mrf.mxu2  ;;  %v228_v54 = vpop.f32.mrf.mxu3 }
  0xa1   :  { %v76_v55 = vpop.f32.mrf.mxu0  ;;  %v105_v56 = vpop.f32.mrf.mxu1 }
  0xa2   :  { %v111_v58 = vmul.f32 %v105_v56, %v76_v55 }
  0xa4   :  { %v114_v59 = vadd.f32 %v113_v57, %v111_v58 }
  0xa6   :  { %v115_v60 = vrot.slane %v114_v59, 4 }
  0xa8   :  { %v116_v61 = vadd.f32 %v115_v60, %v114_v59  ;;  %v202_v62 = vpop.f32.mrf.mxu2  ;;  %v231_v63 = vpop.f32.mrf.mxu3 }
  0xa9   :  { %v320_v1 = vpop.f32.mrf.mxu0  ;;  %v349_v2 = vpop.f32.mrf.mxu1 }
  0xaa   :  { %v117_v3 = vrot.slane %v116_v61, 2 }
  0xac   :  { %v118_v4 = vadd.f32 %v117_v3, %v116_v61 }
  0xae   :  { %v119_v7 = vrot.slane %v118_v4, 1 }
  0xb0   :  { %v120_v8 = vadd.f32 %v119_v7, %v118_v4  ;;  %v447_v9 = vpop.f32.mrf.mxu2  ;;  %v476_v10 = vpop.f32.mrf.mxu3 }
  0xb1   :  { %v323_v11 = vpop.f32.mrf.mxu0  ;;  %v352_v12 = vpop.f32.mrf.mxu1 }
  0xb2   :  { %v127_v13 = vsub.f32 0.0, %v120_v8 }
  0xb4   :  { %v128_v14 = vsel %vm123_vm8, %v120_v8, %v127_v13 }
  0xb5   :  { %v129_v15 = vand.u32 2147483647, %v128_v14  ;;  %vm133_vm6 = vcmp.ge.f32.partialorder %v128_v14, 0.0 }
  0xb7   :  { %v130_v16 = vsub.f32 0.0, %v129_v15 }
  0xb8   :  { %v450_v17 = vpop.f32.mrf.mxu2  ;;  %v479_v18 = vpop.f32.mrf.mxu3 }
  0xb9   :  { %v326_v19 = vpop.f32.mrf.mxu0  ;;  %v355_v20 = vpop.f32.mrf.mxu1  ;;  %v131_v0 = vmul.f32 1.442695, %v130_v16 }
  0xbb   :  { %1208 = vpow2.f32 %v131_v0 }
  0xc0   :  { %v453_v21 = vpop.f32.mrf.mxu2  ;;  %v482_v22 = vpop.f32.mrf.mxu3 }
  0xc1   :  { %v1209_v23 = vpop.eup %1208  ;;  %v329_v24 = vpop.f32.mrf.mxu0 }
  0xc2   :  { %v358_v25 = vpop.f32.mrf.mxu1  ;;  %v134_v26 = vadd.f32 1.0, %v1209_v23 }
  0xc4   :  { %1210 = vrcp.f32 %v134_v26  ;;  %v146_v34 = vand.u32 2147483648, %v134_v26  ;;  %v144_v36 = vand.u32 2147483647, %v134_v26  ;;  %vm140_vm3 = vweird.f32 %v134_v26 }
  0xc6   :  { %v147_v42 = vor.u32 1.1754944e-38, %v146_v34  ;;  %vm145_vm5 = vcmp.eq.f32.partialorder %v144_v36, 8.507059e+37 }
  0xc8   :  { %v456_v27 = vpop.f32.mrf.mxu2  ;;  %v485_v28 = vpop.f32.mrf.mxu3 }
  0xc9   :  { %v574_v29 = vpop.f32.mrf.mxu0 }
  0xca   :  { %v603_v30 = vpop.f32.mrf.mxu1  ;;  %v1211_v31 = vpop.eup %1210 }
  0xcb   :  { %v136_v32 = vmul.f32 %v1211_v31, %v134_v26  ;;  %vm141_vm2 = vweird.f32 %v1211_v31 }
  0xcc   :  { %vm142_vm4 = vmor %vm140_vm3, %vm141_vm2 }
  0xcd   :  { %v137_v33 = vsub.f32 1.0, %v136_v32 }
  0xcf   :  { %v138_v35 = vmul.f32 %v1211_v31, %v137_v33 }
  0xd0   :  { %v701_v37 = vpop.f32.mrf.mxu2  ;;  %v730_v38 = vpop.f32.mrf.mxu3 }
  0xd1   :  { %v577_v39 = vpop.f32.mrf.mxu0  ;;  %v139_v41 = vadd.f32 %v1211_v31, %v138_v35 }
  0xd2   :  { %v606_v40 = vpop.f32.mrf.mxu1 }
  0xd3   :  { %v143_v43 = vsel %vm142_vm4, %v1211_v31, %v139_v41 }
  0xd4   :  { %v148_v44 = vsel %vm145_vm5, %v147_v42, %v143_v43 }
  0xd5   :  { %v150_v45 = vmul.f32 %v1209_v23, %v148_v44 }
  0xd7   :  { %v151_v46 = vsel %vm133_vm6, %v148_v44, %v150_v45 }
  0xd8   :  { %v704_v47 = vpop.f32.mrf.mxu2  ;;  %v733_v48 = vpop.f32.mrf.mxu3  ;;  %v152_v49 = vadd.f32 1e-15, %v151_v46 }
  0xd9   :  { %v580_v50 = vpop.f32.mrf.mxu0 }
  0xda   :  { %v609_v51 = vpop.f32.mrf.mxu1  ;;  %1212 = vlog2.f32 %v152_v49 }
  0xe0   :  { %v1213_v52 = vpop.eup %1212  ;;  %v707_v53 = vpop.f32.mrf.mxu2 }
  0xe1   :  { %v736_v54 = vpop.f32.mrf.mxu3  ;;  %v583_v55 = vpop.f32.mrf.mxu0  ;;  %v154_v57 = vmul.f32 0.6931472, %v1213_v52 }
  0xe2   :  { %v612_v56 = vpop.f32.mrf.mxu1 }
  0xe3   :  { %v155_v58 = vsub.f32 0.0, %v154_v57 }
  0xe5   :  { %v156_v59 = vsel %vm123_vm8, %v155_v58, 0.0  ;;  %v158_v60 = vsel %vm126_vm10, %v155_v58, 0.0 }
  0xe6   :  { %v1050_v61 = vsel %vm1049_vm11, %v156_v59, 0.0  ;;  %v1052_v62 = vsel %vm1051_vm12, %v158_v60, 0.0 }
  0xe7   :  { %v1053_v63 = vadd.f32 %v1052_v62, %v1050_v61 }
  0xe8   :  { %v710_v1 = vpop.f32.mrf.mxu2 }
  0xe9   :  { %v739_v2 = vpop.f32.mrf.mxu3  ;;  %v828_v3 = vpop.f32.mrf.mxu0  ;;  %1054 = vst [vmem:[#allocation2] sm:$0xff] %v1053_v63 }
  0xea   :  { %v857_v4 = vpop.f32.mrf.mxu1  ;;  %1065 = dma.vmem_to_hbm [thread:$0]  %s1061_s4, 128, %s1063_s7, [#allocation3]  }
  0xf0   :  { %v955_v5 = vpop.f32.mrf.mxu2 }
  0xf1   :  { %v984_v7 = vpop.f32.mrf.mxu3  ;;  %v831_v8 = vpop.f32.mrf.mxu0 }
  0xf2   :  { %v860_v9 = vpop.f32.mrf.mxu1 }
  0xf8   :  { %v958_v10 = vpop.f32.mrf.mxu2 }
  0xf9   :  { %v987_v11 = vpop.f32.mrf.mxu3  ;;  %v834_v6 = vpop.f32.mrf.mxu0 }
  0xfa   :  { %v863_v12 = vpop.f32.mrf.mxu1 }
 0x100   :  { %v961_v13 = vpop.f32.mrf.mxu2 }
 0x101   :  { %v990_v14 = vpop.f32.mrf.mxu3  ;;  %v837_v15 = vpop.f32.mrf.mxu0 }
 0x102   :  { %v866_v16 = vpop.f32.mrf.mxu1 }
 0x108   :  { %v964_v17 = vpop.f32.mrf.mxu2 }
 0x109   :  { %v993_v18 = vpop.f32.mrf.mxu3 }
 0x10a   :  { %1238 = dma.done.wait [#allocation3], 128  }
 0x10b   :  { %1239 = vsyncadd [#allocation3], 4294967168 }
 0x10c   :  { %1070 = vsyncpa [#allocation3], 1 }

</bundles_post_ra>
